<compile_context>
chip_gen: v6e
topology: v6e:2x2x1
jax: 0.10.0
libtpu: 0.0.40
codegen_flags: <defaults>
</compile_context>

<pallas_src>
import math

import jax
import jax.numpy as jnp
from jax.experimental import pallas as pl
from jax.experimental.pallas import tpu as pltpu

LEAKY_SLOPE = 0.01   # PyTorch nn.LeakyReLU default negative_slope
BN_EPS = 1e-5        # PyTorch nn.BatchNorm1d default eps


def _round_up(n: int, m: int) -> int:
    return ((n + m - 1) // m) * m


# ----------------------------------------------------------------------------
# Parameter preparation (wrapper-side, outside the kernel)
# ----------------------------------------------------------------------------
def make_params(key, in_size, fil_num, out_size=2):
    """Deterministic synthetic parameters matching the PyTorch module (eval mode)."""
    ks = jax.random.split(key, 10)

    def lin(k, fan_in, fan_out):
        bound = 1.0 / math.sqrt(fan_in)
        kw, kb = jax.random.split(k)
        w = jax.random.uniform(kw, (fan_in, fan_out), jnp.float32, -bound, bound)
        b = jax.random.uniform(kb, (1, fan_out), jnp.float32, -bound, bound)
        return w, b

    w1, b1 = lin(ks[0], in_size, fil_num)      # fc1 (transposed layout)
    w2, b2 = lin(ks[1], fil_num, out_size)     # fc2 (transposed layout)

    # BatchNorm1d(in_size) — eval-mode params / running stats
    g1    = 1.0 + 0.1 * jax.random.normal(ks[2], (1, in_size), jnp.float32)
    beta1 = 0.1 * jax.random.normal(ks[3], (1, in_size), jnp.float32)
    rm1   = 0.1 * jax.random.normal(ks[4], (1, in_size), jnp.float32)
    rv1   = 1.0 + 0.1 * jnp.abs(jax.random.normal(ks[5], (1, in_size), jnp.float32))
    # BatchNorm1d(fil_num)
    g2    = 1.0 + 0.1 * jax.random.normal(ks[6], (1, fil_num), jnp.float32)
    beta2 = 0.1 * jax.random.normal(ks[7], (1, fil_num), jnp.float32)
    rm2   = 0.1 * jax.random.normal(ks[8], (1, fil_num), jnp.float32)
    rv2   = 1.0 + 0.1 * jnp.abs(jax.random.normal(ks[9], (1, fil_num), jnp.float32))

    return {
        "w1": w1, "b1": b1, "w2": w2, "b2": b2,
        "g1": g1, "beta1": beta1, "rm1": rm1, "rv1": rv1,
        "g2": g2, "beta2": beta2, "rm2": rm2, "rv2": rv2,
    }


def fold_and_pack_params(p, *, compute_dtype=jnp.float32):
    """Fold BN1/BN2 into fc1, pad the hidden dim to lane width, pack biases.

    Exact only in eval mode (fixed running stats); Dropout is identity at inference.
    """
    in_size, fil_num = p["w1"].shape
    out_size = p["w2"].shape[1]

    # BN eval-mode affine: bn(x) = x * scale + shift
    scale1 = p["g1"] * jax.lax.rsqrt(p["rv1"] + BN_EPS)          # (1, in_size)
    shift1 = p["beta1"] - p["rm1"] * scale1
    scale2 = p["g2"] * jax.lax.rsqrt(p["rv2"] + BN_EPS)          # (1, fil_num)
    shift2 = p["beta2"] - p["rm2"] * scale2

    # bn2(fc1(bn1(x))) == x @ Wf + bf
    wf = (scale1.T * p["w1"]) * scale2                           # (in_size, fil_num)
    bf = (shift1 @ p["w1"] + p["b1"]) * scale2 + shift2          # (1, fil_num)

    # Lane-dense padding for the matmuls only (never written back to HBM).
    # Do NOT pad beyond 128 — the kernel is memory/overhead-bound, not MXU-bound.
    fil_pad = _round_up(fil_num, 128)
    out_pad = _round_up(out_size, 128)
    wf_p = jnp.zeros((in_size, fil_pad), jnp.float32).at[:, :fil_num].set(wf)
    w2_p = jnp.zeros((fil_pad, out_pad), jnp.float32).at[:fil_num, :out_size].set(p["w2"])

    # Pack both bias rows into a single (2, fil_pad) operand (one tiny DMA).
    assert out_size <= fil_pad, "bias packing assumes out_size <= fil_pad"
    biases = jnp.zeros((2, fil_pad), jnp.float32)
    biases = biases.at[0, :fil_num].set(bf[0])
    biases = biases.at[1, :out_size].set(p["b2"][0])

    return {
        "wf": wf_p.astype(compute_dtype),
        "w2": w2_p.astype(compute_dtype),
        "biases": biases,                     # stays f32 (added to f32 accumulator)
        "compute_dtype": jnp.dtype(compute_dtype),
        "in_size": in_size,
        "fil_pad": fil_pad,
        "out_pad": out_pad,
        "out_size": out_size,
    }


# ----------------------------------------------------------------------------
# Pallas kernel + wrapper
# ----------------------------------------------------------------------------
def mlp_a_forward(x, packed, *, tb_max=1024, vmem_budget_bytes=10 * 1024 * 1024):
    """Full _MLP_A forward (inference) in one Pallas kernel, gridded over batch."""
    batch, in_size = x.shape
    assert in_size == packed["in_size"]
    fil_pad = packed["fil_pad"]
    out_pad = packed["out_pad"]
    out_size = packed["out_size"]
    compute_dtype = packed["compute_dtype"]
    wf, w2, biases = packed["wf"], packed["w2"], packed["biases"]

    x_item = jnp.dtype(x.dtype).itemsize
    w_item = jnp.dtype(compute_dtype).itemsize

    # ---- batch-tile selection ------------------------------------------------
    # At least 2 grid steps whenever possible so ("parallel",) lets both v7x
    # TensorCores work; tile chosen so batch padding is at most a few rows.
    n_tiles = max(1, pl.cdiv(batch, tb_max))
    if n_tiles < 2 and batch >= 16:
        n_tiles = 2
    if n_tiles == 1:
        tb = batch                                  # full-dim block, no padding needed
    else:
        tb = _round_up(pl.cdiv(batch, n_tiles), 8)
        # v5e-safe VMEM cap (16 MiB default scoped): x/out double-buffers plus
        # f32 h/a intermediate headroom, weights single-buffered (Buffered(1)).
        weight_vmem = (wf.size + w2.size) * w_item + 8 * fil_pad * 4
        per_row = 2 * in_size * x_item + 2 * out_size * 4 + 2 * fil_pad * 4
        max_tb = max(8, ((vmem_budget_bytes - weight_vmem) // per_row) // 8 * 8)
        tb = min(tb, max_tb)

    grid_n = pl.cdiv(batch, tb)
    padded_batch = grid_n * tb
    if padded_batch != batch:
        # Only for ragged batches; pad is < 8 rows per tile thanks to the tile
        # choice above.  X is otherwise passed through untouched (no cast copy).
        x = jnp.pad(x, ((0, padded_batch - batch), (0, 0)))

    def kernel(x_ref, wf_ref, b_ref, w2_ref, out_ref):
        xv = x_ref[...]
        if xv.dtype != compute_dtype:
            xv = xv.astype(compute_dtype)           # in-kernel cast (free VPU filler)
        # (BN1 -> Dropout=id -> fc1 -> BN2) folded into one affine in the wrapper.
        h = jnp.dot(xv, wf_ref[...], preferred_element_type=jnp.float32)
        h = h + b_ref[0:1, :]
        # LeakyReLU (f32); Dropout = identity at inference.
        a = jnp.where(h > 0, h, LEAKY_SLOPE * h)
        # fc2: lane-dense matmul over the padded hidden dim, then keep only the
        # 2 real logits so the HBM writeback is narrow.
        y = jnp.dot(a.astype(compute_dtype), w2_ref[...],
                    preferred_element_type=jnp.float32)
        out_ref[...] = (y[:, :out_size] + b_ref[1:2, :out_size]).astype(out_ref.dtype)

    flops = 2 * padded_batch * (in_size * fil_pad + fil_pad * out_pad)
    bytes_accessed = (
        padded_batch * in_size * x_item            # X (native dtype, no wrapper copy)
        + (wf.size + w2.size) * w_item             # weights (read once, resident)
        + biases.size * 4                          # packed biases (f32)
        + padded_batch * out_size * 4              # narrow f32 output writeback
    )

    out = pl.pallas_call(
        kernel,
        out_shape=jax.ShapeDtypeStruct((padded_batch, out_size), jnp.float32),
        grid=(grid_n,),
        in_specs=[
            # Activations: tiled over batch, dtype as supplied by the caller.
            pl.BlockSpec((tb, in_size), lambda i: (i, 0)),
            # Grid-invariant operands: constant index map + single buffer.
            pl.BlockSpec((in_size, fil_pad), lambda i: (0, 0),
                         pipeline_mode=pl.Buffered(1)),
            pl.BlockSpec(biases.shape, lambda i: (0, 0),
                         pipeline_mode=pl.Buffered(1)),
            pl.BlockSpec((fil_pad, out_pad), lambda i: (0, 0),
                         pipeline_mode=pl.Buffered(1)),
        ],
        # Narrow output block: last dim equals the full array dim (=2), so this
        # is a legal BlockSpec and the HBM write stays contiguous & 64x smaller.
        out_specs=pl.BlockSpec((tb, out_size), lambda i: (i, 0)),
        compiler_params=pltpu.CompilerParams(
            dimension_semantics=("parallel",)),     # v7x: shard batch over 2 TCs
        cost_estimate=pl.CostEstimate(
            flops=flops, transcendentals=0, bytes_accessed=bytes_accessed),
    )(x, wf, biases, w2)

    return out[:batch] if padded_batch != batch else out


# ----------------------------------------------------------------------------
# Pure-JAX reference (PyTorch eval-mode semantics, full f32)
# ----------------------------------------------------------------------------
def mlp_a_ref(x, p):
    u = (x - p["rm1"]) * jax.lax.rsqrt(p["rv1"] + BN_EPS) * p["g1"] + p["beta1"]
    v = u @ p["w1"] + p["b1"]
    w = (v - p["rm2"]) * jax.lax.rsqrt(p["rv2"] + BN_EPS) * p["g2"] + p["beta2"]
    a = jnp.where(w > 0, w, LEAKY_SLOPE * w)
    return a @ p["w2"] + p["b2"]


if __name__ == "__main__":
    # Small shapes consistent with the module: X is [batch, in_size]; fil_num hidden.
    batch, in_size, fil_num, out_size = 8, 32, 32, 2

    key = jax.random.PRNGKey(0)
    kx, kp = jax.random.split(key)
    x = jax.random.normal(kx, (batch, in_size), jnp.float32)
    params = make_params(kp, in_size, fil_num, out_size)
    ref = mlp_a_ref(x, params)

    # 1) f32 compute path (default): folding + padding + packing ~exact.
    packed_f32 = fold_and_pack_params(params, compute_dtype=jnp.float32)
    out_f32 = jax.block_until_ready(mlp_a_forward(x, packed_f32))
    assert out_f32.shape == (batch, out_size)
    assert jnp.allclose(out_f32, ref, atol=1e-4, rtol=1e-4)

    # 2) bf16 matmul operands (cast in-kernel), f32 MXU accumulation.
    packed_bf16 = fold_and_pack_params(params, compute_dtype=jnp.bfloat16)
    out_bf16 = jax.block_until_ready(mlp_a_forward(x, packed_bf16))
    assert out_bf16.shape == (batch, out_size)
    assert jnp.allclose(out_bf16, ref, atol=5e-2, rtol=5e-2)

    # 3) multi-tile grid + ragged batch (exercises grid>1 and the minimal-pad path).
    batch2 = 20
    x2 = jax.random.normal(jax.random.PRNGKey(1), (batch2, in_size), jnp.float32)
    ref2 = mlp_a_ref(x2, params)
    out2 = jax.block_until_ready(mlp_a_forward(x2, packed_f32, tb_max=8))
    assert out2.shape == (batch2, out_size)
    assert jnp.allclose(out2, ref2, atol=1e-4, rtol=1e-4)

    print("KERNEL_OK")
</pallas_src>

<mosaic_0001>
module attributes {stable_mosaic.version = 11 : i64} {
  func.func @kernel(%arg0: i32, %arg1: memref<8x32xf32, #tpu.memory_space<vmem>>, %arg2: memref<32x128xf32, #tpu.memory_space<vmem>>, %arg3: memref<2x128xf32, #tpu.memory_space<vmem>>, %arg4: memref<128x128xf32, #tpu.memory_space<vmem>>, %arg5: memref<8x2xf32, #tpu.memory_space<vmem>>) attributes {dimension_semantics = [#tpu.dimension_semantics<parallel>], iteration_bounds = array<i64: 1>, scalar_prefetch = 0 : i64, scratch_operands = 0 : i64, tpu.core_type = #tpu.core_type<tc>, window_params = [{transform_indices = @transform_0, window_bounds = array<i64: 8, 32>}, {pipeline_mode = #tpu.pipeline_mode<synchronous>, transform_indices = @transform_1, window_bounds = array<i64: 32, 128>}, {pipeline_mode = #tpu.pipeline_mode<synchronous>, transform_indices = @transform_2, window_bounds = array<i64: 2, 128>}, {pipeline_mode = #tpu.pipeline_mode<synchronous>, transform_indices = @transform_3, window_bounds = array<i64: 128, 128>}, {transform_indices = @transform_4, window_bounds = array<i64: 8, 2>}]} {
    %c0 = arith.constant 0 : index
    %c0_0 = arith.constant 0 : index
    %0 = vector.load %arg1[%c0, %c0_0] : memref<8x32xf32, #tpu.memory_space<vmem>>, vector<8x32xf32>
    %c0_1 = arith.constant 0 : index
    %c0_2 = arith.constant 0 : index
    %1 = vector.load %arg2[%c0_1, %c0_2] : memref<32x128xf32, #tpu.memory_space<vmem>>, vector<32x128xf32>
    %cst = arith.constant dense<0.000000e+00> : vector<8x128xf32>
    %2 = tpu.matmul %0, %1, %cst {dimension_numbers = #tpu.dot_dimension_numbers<[1], [0], [0], [1], [0, 0, 1, 1], [], []>} : vector<8x32xf32>, vector<32x128xf32>, vector<8x128xf32> -> vector<8x128xf32>
    %c0_3 = arith.constant 0 : index
    %c0_4 = arith.constant 0 : index
    %3 = vector.load %arg3[%c0_3, %c0_4] : memref<2x128xf32, #tpu.memory_space<vmem>>, vector<1x128xf32>
    %4 = vector.broadcast %3 : vector<1x128xf32> to vector<8x128xf32>
    %5 = arith.addf %2, %4 : vector<8x128xf32>
    %cst_5 = arith.constant 0.000000e+00 : f32
    %6 = vector.broadcast %cst_5 : f32 to vector<8x128xf32>
    %7 = arith.cmpf ogt, %5, %6 : vector<8x128xf32>
    %cst_6 = arith.constant 0.00999999977 : f32
    %8 = vector.broadcast %cst_6 : f32 to vector<8x128xf32>
    %9 = arith.mulf %8, %5 : vector<8x128xf32>
    %10 = arith.select %7, %5, %9 : vector<8x128xi1>, vector<8x128xf32>
    %c0_7 = arith.constant 0 : index
    %c0_8 = arith.constant 0 : index
    %11 = vector.load %arg4[%c0_7, %c0_8] : memref<128x128xf32, #tpu.memory_space<vmem>>, vector<128x128xf32>
    %cst_9 = arith.constant dense<0.000000e+00> : vector<8x128xf32>
    %12 = tpu.matmul %10, %11, %cst_9 {dimension_numbers = #tpu.dot_dimension_numbers<[1], [0], [0], [1], [0, 0, 1, 1], [], []>} : vector<8x128xf32>, vector<128x128xf32>, vector<8x128xf32> -> vector<8x128xf32>
    %13 = vector.extract_strided_slice %12 {offsets = [0, 0], sizes = [8, 2], strides = [1, 1]} : vector<8x128xf32> to vector<8x2xf32>
    %c1 = arith.constant 1 : index
    %c0_10 = arith.constant 0 : index
    %14 = vector.load %arg3[%c1, %c0_10] : memref<2x128xf32, #tpu.memory_space<vmem>>, vector<1x2xf32>
    %15 = vector.broadcast %14 : vector<1x2xf32> to vector<8x2xf32>
    %16 = arith.addf %13, %15 : vector<8x2xf32>
    %c0_11 = arith.constant 0 : index
    %c0_12 = arith.constant 0 : index
    %17 = vector.load %arg5[%c0_11, %c0_12] : memref<8x2xf32, #tpu.memory_space<vmem>>, vector<8x2xf32>
    tpu.vector_store %arg5[%c0_11, %c0_12], %16 {strides = array<i32>} : memref<8x2xf32, #tpu.memory_space<vmem>>, vector<8x2xf32>,
    return
  }
  func.func @transform_0(%arg0: i32) -> (i32, i32) {
    %c0_i32 = arith.constant 0 : i32
    %c0_i32_0 = arith.constant 0 : i32
    return %arg0, %c0_i32 : i32, i32
  }
  func.func @transform_1(%arg0: i32) -> (i32, i32) {
    %c0_i32 = arith.constant 0 : i32
    %c0_i32_0 = arith.constant 0 : i32
    %c0_i32_1 = arith.constant 0 : i32
    return %c0_i32, %c0_i32_0 : i32, i32
  }
  func.func @transform_2(%arg0: i32) -> (i32, i32) {
    %c0_i32 = arith.constant 0 : i32
    %c0_i32_0 = arith.constant 0 : i32
    %c0_i32_1 = arith.constant 0 : i32
    return %c0_i32, %c0_i32_0 : i32, i32
  }
  func.func @transform_3(%arg0: i32) -> (i32, i32) {
    %c0_i32 = arith.constant 0 : i32
    %c0_i32_0 = arith.constant 0 : i32
    %c0_i32_1 = arith.constant 0 : i32
    return %c0_i32, %c0_i32_0 : i32, i32
  }
  func.func @transform_4(%arg0: i32) -> (i32, i32) {
    %c0_i32 = arith.constant 0 : i32
    %c0_i32_0 = arith.constant 0 : i32
    return %arg0, %c0_i32 : i32, i32
  }
}

</mosaic_0001>

<bundles_post_ra>
// kernel: tpu_custom_call.1
= control target key start
LH: loop header
LB: loop body
LE: loop exit
PB: predicated region body
PF: predicated region fallthrough
CT: control target
= control target key end

     0   :  { %9 = vsyncpa [#allocation3], 0  ;;  %s457_s0 = inlined_call_operand.hbm [shape: f32[8,32], index: 0, kind: input, shape index: {}]   ;;  %s458_s1 = inlined_call_operand.hbm [shape: f32[32,128], index: 1, kind: input, shape index: {}]   ;;  %s459_s2 = inlined_call_operand.vmem [shape: f32[2,128], index: 2, kind: input, shape index: {}]   ;;  %s460_s3 = inlined_call_operand.hbm [shape: f32[128,128], index: 3, kind: input, shape index: {}]   ;;  %s461_s4 = inlined_call_operand.vmem [shape: f32[8,2], index: 4, kind: output, shape index: {}]  }
   0x1   :  { %10 = vsyncpa [#allocation5], 0  ;;  %s385_s15 = smov [#allocation4]  }
   0x2   :  { %s26_s16 = sshll.u32 %s385_s15, 4  ;;  %s27_s16 = int_to_ptr.vmem [resolvable:$true] %s26_s16 }
   0x3   :  { %s329_s17 = scalar_lea.vmem %s27_s16, 512  ;;  %p334_p1 = scmp.lt.s32.totalorder %s27_s16, %s27_s16 }
   0x4   :  { %p330_p0 = scmp.ne.s32.totalorder %s27_s16, %s329_s17  ;;  %p335_p2 = scmp.lt.s32.totalorder %s329_s17, %s329_s17 }
   0x6   :  { %p336_p3 = por %p335_p2, %p334_p1 }
   0x8   :  { %p337_p4 = pnand %p336_p3, %p330_p0 }
   0xa   :  { %340 = shalt.err (!%p337_p4)
}
   0xb   :  { %s386_s18 = smov 128   ;;  %s387_s19 = smov 8  }
   0xc   :  { %32 = dma.hbm_to_vmem [thread:$0]  %s458_s1, 512, %s27_s16, [#allocation5], %s386_s18, %s386_s18, %s387_s19  }
   0xd   :  { %s388_s22 = smov [#allocation2]   ;;  %s389_s24 = smov [#allocation6]  }
   0xe   :  { %s17_s23 = sshll.u32 %s388_s22, 4  ;;  %s40_s25 = sshll.u32 %s389_s24, 4  ;;  %s18_s23 = int_to_ptr.vmem [resolvable:$true] %s17_s23  ;;  %s41_s25 = int_to_ptr.vmem [resolvable:$true] %s40_s25 }
   0xf   :  { %s349_s26 = scalar_lea.vmem %s18_s23, 128  ;;  %p354_p6 = scmp.lt.s32.totalorder %s18_s23, %s18_s23 }
  0x10   :  { %p350_p5 = scmp.ne.s32.totalorder %s18_s23, %s349_s26  ;;  %p355_p7 = scmp.lt.s32.totalorder %s349_s26, %s349_s26 }
  0x12   :  { %p356_p8 = por %p355_p7, %p354_p6 }
  0x14   :  { %p357_p9 = pnand %p356_p8, %p350_p5 }
  0x16   :  { %360 = shalt.err (!%p357_p9)
}
  0x17   :  { %20 = dma.hbm_to_vmem [thread:$0]  %s457_s0, 128, %s18_s23, [#allocation3]  }
  0x18   :  { %s369_s29 = scalar_lea.vmem %s41_s25, 2048  ;;  %p374_p11 = scmp.lt.s32.totalorder %s41_s25, %s41_s25 }
  0x19   :  { %p370_p10 = scmp.ne.s32.totalorder %s41_s25, %s369_s29  ;;  %p375_p12 = scmp.lt.s32.totalorder %s369_s29, %s369_s29 }
  0x1b   :  { %p376_p13 = por %p375_p12, %p374_p11 }
  0x1d   :  { %p377_p0 = pnand %p376_p13, %p370_p10 }
  0x1f   :  { %380 = shalt.err (!%p377_p0)
}
  0x20   :  { %46 = dma.hbm_to_vmem [thread:$0]  %s460_s3, 2048, %s41_s25, [#allocation5], %s386_s18, %s386_s18, %s387_s19  }
  0x21   :  { %381 = dma.done.wait [#allocation3], 128  }
  0x22   :  { %382 = vsyncadd [#allocation3], 4294967168 }
  0x23   :  { %383 = dma.done.wait [#allocation5], 2560  }
  0x24   :  { %384 = vsyncadd [#allocation5], 4294964736  ;;  %v390_v0 = vmov 0.0   ;;  %vm391_vm0 = vmmov 0   ;;  %v60_v1 = vld [vmem:[#allocation4 + $0x18] sm:$0xff]  ;;  %v59_v2 = vld [vmem:[#allocation4 + $0x10] sm:$0xff] }
  0x25   :  { %268 = vmatprep.subr.mxu0 %v390_v0  ;;  %276 = vmatprep.mubr.msk.f32.mxu0 %vm391_vm0, %v390_v0  ;;  %v158_v3 = vld [vmem:[#allocation6 + $0x78] sm:$0xff]  ;;  %v58_v4 = vld [vmem:[#allocation4 + $0x8] sm:$0xff]  ;;  %v157_v5 = vld [vmem:[#allocation6 + $0x70] sm:$0xff]  ;;  %vm66_vm1 = vcmask 261120   ;;  %vm235_vm3 = vcmask 15360  }
  0x26   :  { %279 = vmatprep.subr.mxu1 %v390_v0  ;;  %311 = vmatprep.mubr.msk.f32.mxu1 %vm391_vm0, %v390_v0  ;;  %v156_v6 = vld [vmem:[#allocation6 + $0x68] sm:$0xff]  ;;  %v57_v7 = vld [vmem:[#allocation4] sm:$0xff]  ;;  %v56_v8 = vld [vmem:[#allocation2] sm:$0xff] }
  0x27   :  { %269 = vmatpush3.msra.mxu0 %v60_v1  ;;  %280 = vmatpush3.msra.mxu1 %v158_v3  ;;  %v155_v9 = vld [vmem:[#allocation6 + $0x60] sm:$0xff]  ;;  %v154_v10 = vld [vmem:[#allocation6 + $0x58] sm:$0xff]  ;;  %v153_v11 = vld [vmem:[#allocation6 + $0x50] sm:$0xff] }
  0x28   :  { %270 = vmatprep.subr.mxu0 %v390_v0  ;;  %281 = vmatprep.subr.mxu1 %v390_v0  ;;  %v152_v12 = vld [vmem:[#allocation6 + $0x48] sm:$0xff]  ;;  %v151_v13 = vld [vmem:[#allocation6 + $0x40] sm:$0xff]  ;;  %v150_v14 = vld [vmem:[#allocation6 + $0x38] sm:$0xff] }
  0x29   :  { %271 = vmatpush3.msra.mxu0 %v59_v2  ;;  %282 = vmatpush3.msra.mxu1 %v157_v5  ;;  %v149_v15 = vld [vmem:[#allocation6 + $0x30] sm:$0xff]  ;;  %v148_v16 = vld [vmem:[#allocation6 + $0x28] sm:$0xff]  ;;  %v147_v17 = vld [vmem:[#allocation6 + $0x20] sm:$0xff] }
  0x2a   :  { %272 = vmatprep.subr.mxu0 %v390_v0  ;;  %283 = vmatprep.subr.mxu1 %v390_v0  ;;  %v146_v18 = vld [vmem:[#allocation6 + $0x18] sm:$0xff]  ;;  %v145_v19 = vld [vmem:[#allocation6 + $0x10] sm:$0xff]  ;;  %v144_v20 = vld [vmem:[#allocation6 + $0x8] sm:$0xff] }
  0x2b   :  { %273 = vmatpush3.msra.mxu0 %v58_v4  ;;  %284 = vmatpush3.msra.mxu1 %v156_v6  ;;  %v143_v21 = vld [vmem:[#allocation6] sm:$0xff]  ;;  %v243_v22 = vld [vmem:[%s459_s2] ss:$0 sm:$0xff]  ;;  %v245_v28 = vld [vmem:[%s459_s2 + $0x1] ss:$0 sm:$0xff] }
  0x2c   :  { %274 = vmatprep.subr.mxu0 %v390_v0  ;;  %285 = vmatprep.subr.mxu1 %v390_v0 }
  0x2d   :  { %275 = vmatpush3.msra.mxu0 %v57_v7  ;;  %286 = vmatpush3.msra.mxu1 %v155_v9 }
  0x2e   :  { %277 = vmatmul.mubr.msk.f32.vlgmr.msra.gmra.mxu0 %vm66_vm1, %v56_v8  ;;  %287 = vmatprep.subr.mxu1 %v390_v0 }
  0x2f   :  { %288 = vmatpush3.msra.mxu1 %v154_v10 }
  0x30   :  { %289 = vmatprep.subr.mxu1 %v390_v0 }
  0x31   :  { %290 = vmatpush3.msra.mxu1 %v153_v11 }
  0x32   :  { %291 = vmatprep.subr.mxu1 %v390_v0 }
  0x33   :  { %292 = vmatpush3.msra.mxu1 %v152_v12 }
  0x34   :  { %293 = vmatprep.subr.mxu1 %v390_v0 }
  0x35   :  { %294 = vmatpush3.msra.mxu1 %v151_v13 }
  0x36   :  { %295 = vmatprep.subr.mxu1 %v390_v0 }
  0x37   :  { %296 = vmatpush3.msra.mxu1 %v150_v14 }
  0x38   :  { %297 = vmatprep.subr.mxu1 %v390_v0 }
  0x39   :  { %298 = vmatpush3.msra.mxu1 %v149_v15 }
  0x3a   :  { %299 = vmatprep.subr.mxu1 %v390_v0 }
  0x3b   :  { %300 = vmatpush3.msra.mxu1 %v148_v16 }
  0x3c   :  { %301 = vmatprep.subr.mxu1 %v390_v0 }
  0x3d   :  { %302 = vmatpush3.msra.mxu1 %v147_v17 }
  0x3e   :  { %303 = vmatprep.subr.mxu1 %v390_v0 }
  0x3f   :  { %304 = vmatpush3.msra.mxu1 %v146_v18 }
  0x40   :  { %305 = vmatprep.subr.mxu1 %v390_v0 }
  0x41   :  { %306 = vmatpush3.msra.mxu1 %v145_v19 }
  0x42   :  { %307 = vmatprep.subr.mxu1 %v390_v0 }
  0x43   :  { %308 = vmatpush3.msra.mxu1 %v144_v20 }
  0x44   :  { %309 = vmatprep.subr.mxu1 %v390_v0 }
  0x45   :  { %310 = vmatpush3.msra.mxu1 %v143_v21 }
  0xee   :  { %v136_v23 = vpop.f32.mrf.mxu0 }
  0xef   :  { %v137_v24 = vadd.f32 %v243_v22, %v136_v23 }
  0xf0   :  { %v278_v25 = vpop.f32.mrf.mxu0 }
  0xf1   :  { %v141_v26 = vmul.f32 0.01, %v137_v24  ;;  %vm140_vm2 = vcmp.gt.f32.partialorder %v137_v24, 0.0 }
  0xf3   :  { %v142_v27 = vsel %vm140_vm2, %v137_v24, %v141_v26 }
  0xf4   :  { %312 = vmatmul.mubr.f32.vlgmr.msra.gmra.mxu1 %v142_v27 }
 0x1b4   :  { %v225_v29 = vpop.f32.mrf.mxu1 }
 0x1b5   :  { %v234_v30 = vadd.f32 %v245_v28, %v225_v29 }
 0x1b6   :  { %v313_v31 = vpop.f32.mrf.mxu1 }
 0x1b7   :  { %236 = vst.msk [vmem:[%s461_s4] sm:$0xff] %vm235_vm3, %v234_v30 }
 0x1b8   :  { %241 = vsyncpa [#allocation3], 1 }
 0x1b9   :  { %242 = vsyncpa [#allocation5], 1 }

</bundles_post_ra>
